<compile_context>
chip_gen: v7x
topology: tpu7x:2x2x1
jax: 0.10.0
libtpu: 0.0.40
codegen_flags: <defaults>
</compile_context>

<pallas_src>
import functools

import jax
import jax.numpy as jnp
from jax import lax
from jax.experimental import pallas as pl
from jax.experimental.pallas import tpu as pltpu

LN_EPS = 1e-5  # PyTorch nn.LayerNorm default


# ----------------------------------------------------------------------------
# Pallas kernel: fused conv_x/conv_z (in-kernel im2col, dy folded into the MXU
# contraction) + LayerNorm + highway gating.  Channel-major: (channels, rows).
# ----------------------------------------------------------------------------
def ghu_kernel(xz_ref, w_ref, prm_ref, msk_ref, out_ref, *,
               num_channels, filter_size, width, rows):
    C, k, W = num_channels, filter_size, width
    pad = k // 2
    C2, C4 = 2 * C, 4 * C
    wide = rows + (k - 1) * W                       # stack width (rows + dy halo)

    # ---- build the dx-shifted stack once (bf16), folding the W-boundary mask
    parts = []
    for dx in range(k):
        sl = xz_ref[:, dx:dx + wide]                # (2C, wide) bf16, static slice
        if dx != pad:                               # zero wrapped W-boundary cols
            sl = sl * msk_ref[dx:dx + 1, :]
        parts.append(sl)
    stack = jnp.concatenate(parts, axis=0)          # (k*2C, wide) bf16

    # ---- fused conv_x/conv_z: k matmuls, contraction depth k*2C, f32 acc ----
    acc = jnp.dot(w_ref[0], stack[:, 0:rows],
                  preferred_element_type=jnp.float32)
    for dy in range(1, k):
        acc = acc + jnp.dot(w_ref[dy], stack[:, dy * W: dy * W + rows],
                            preferred_element_type=jnp.float32)

    acc = acc + prm_ref[:, 0:1]                     # conv biases [bx ; bz] (f32)
    gamma = prm_ref[:, 1:2]
    beta_sum = prm_ref[:C2, 2:3]                    # beta_x + beta_z, pre-combined

    def layer_norm(t):                              # over the channel (sublane) axis
        mu = jnp.mean(t, axis=0, keepdims=True)
        var = jnp.mean((t - mu) * (t - mu), axis=0, keepdims=True)
        return (t - mu) * lax.rsqrt(var + LN_EPS)

    gates = (layer_norm(acc[:C2, :]) * gamma[:C2, :]
             + layer_norm(acc[C2:, :]) * gamma[C2:, :]
             + beta_sum)

    p = jnp.tanh(gates[:C, :])                      # EUP
    u = jax.nn.sigmoid(gates[C:, :])                # EUP

    # un-convolved z at the window centre, read from the z half of the slab
    center = pad * W + pad
    z_prev = xz_ref[C:, center:center + rows].astype(jnp.float32)

    # z + u*(p - z) == u*p + (1-u)*z, one fewer multiply
    out_ref[...] = (z_prev + u * (p - z_prev)).astype(out_ref.dtype)


# ----------------------------------------------------------------------------
# Wrapper: NCHW in -> NCHW out (concat/pad/reshape only, no relayout passes).
# ----------------------------------------------------------------------------
def _pick_tile_h(H, W, B, target_rows=2048, min_grid=4):
    """Pick tile_h dividing H such that rows = tile_h*W is lane-dense
    (multiple of 128), at most `target_rows`, and preferably gives at least
    `min_grid` grid steps (B * H/tile_h) so the pipeline can overlap DMA."""
    cands = [t for t in range(1, H + 1) if H % t == 0 and (t * W) % 128 == 0]
    if not cands:
        return H  # non-lane-dense fallback: masked partial stores (perf cliff)
    pipe = [t for t in cands if t * W <= target_rows and B * (H // t) >= min_grid]
    if pipe:
        return max(pipe)
    fit = [t for t in cands if t * W <= target_rows]
    return max(fit) if fit else min(cands)


def ghu_forward(x, z, params, *, filter_size, num_channels, tile_h=None):
    """GHUBase.forward.  x, z: (B, C, H, W) float32.  Returns (B, C, H, W)."""
    C, k = num_channels, filter_size
    assert k % 2 == 1, "filter_size must be odd for 'same' padding"
    B, Cin, H, W = x.shape
    assert Cin == C
    if z is None:
        z = jnp.zeros_like(x)

    pad = k // 2
    C2, C4 = 2 * C, 4 * C

    if tile_h is None:
        tile_h = _pick_tile_h(H, W, B)
    assert H % tile_h == 0, "tile_h must divide H"  # TODO(synk): masked tail tile
    rows = tile_h * W
    R = H // tile_h
    assert R == 1 or rows % 128 == 0, "row tile must be lane-dense (128-multiple)"
    wide = rows + (k - 1) * W                       # in-kernel stack width
    seg_len = wide + (k - 1)                        # slab segment incl. dx halo

    bf16 = jnp.bfloat16
    f32 = jnp.float32

    # ---- streaming slab (bf16): channel-major, H zero-padded, flat spatial ---
    xz = jnp.concatenate([x, z], axis=1).astype(bf16)           # (B, 2C, H, W)
    xz = jnp.pad(xz, ((0, 0), (0, 0), (pad, pad), (0, 0)))      # zero-pad H
    xz = xz.reshape(B, C2, (H + 2 * pad) * W)                   # flatten spatial
    xz = jnp.pad(xz, ((0, 0), (0, 0), (pad, pad)))              # flat guard elems
    if R == 1:
        xz_seg = xz[:, None]                                    # no extra copy
    else:
        # TODO(synk): replace with memory_space=pl.ANY + manual double-buffered
        #             halo DMA (P4) to avoid this extra HBM pass when R > 1.
        xz_seg = jnp.stack(
            [xz[:, :, r * rows: r * rows + seg_len] for r in range(R)],
            axis=1)                                             # (B, R, 2C, seg_len)

    # ---- fused block-diagonal conv weight, dy-major: (k, 4C, k*2C) bf16 ------
    # w_cat[dy, o, dx*2C + c] = conv weight at tap (dy, dx), out o, in c of [x;z]
    wx_t = jnp.transpose(params["wx"].astype(f32), (2, 0, 3, 1))  # (k, 2C, k, C)
    wz_t = jnp.transpose(params["wz"].astype(f32), (2, 0, 3, 1))  # (k, 2C, k, C)
    w_cat = jnp.zeros((k, C4, k, C2), f32)
    w_cat = w_cat.at[:, :C2, :, :C].set(wx_t)
    w_cat = w_cat.at[:, C2:, :, C:].set(wz_t)
    w_cat = w_cat.reshape(k, C4, k * C2).astype(bf16)

    # ---- biases + LN affine (f32), beta pre-combined: (4C, 3) ----------------
    bias = jnp.concatenate([params["bx"], params["bz"]])
    gamma = jnp.concatenate([params["gamma_x"], params["gamma_z"]])
    beta_sum = params["beta_x"] + params["beta_z"]
    beta_col = jnp.concatenate([beta_sum, jnp.zeros_like(beta_sum)])
    prm = jnp.stack([bias, gamma, beta_col], axis=1).astype(f32)   # (4C, 3)

    # ---- W-boundary ('same' pad) masks, width = wide, bf16 -------------------
    # mask[dx][t] depends only on t mod W, so it is valid for every dy tap.
    t_idx = jnp.arange(wide) % W
    col_mask = jnp.stack(
        [((t_idx + (dx - pad) >= 0) & (t_idx + (dx - pad) < W))
         for dx in range(k)], axis=0).astype(bf16)                 # (k, wide)

    kern = functools.partial(ghu_kernel, num_channels=C, filter_size=k,
                             width=W, rows=rows)

    out_flat = pl.pallas_call(
        kern,
        out_shape=jax.ShapeDtypeStruct((B, C, H * W), x.dtype),
        grid_spec=pltpu.PrefetchScalarGridSpec(
            num_scalar_prefetch=0,
            grid=(B, R),
            in_specs=[
                # streamed halo'd slab segment per (batch, row-tile), bf16
                pl.BlockSpec((None, None, C2, seg_len), lambda b, r: (b, r, 0, 0)),
                # constant blocks (fetched once)
                pl.BlockSpec((k, C4, k * C2), lambda b, r: (0, 0, 0)),
                pl.BlockSpec((C4, 3), lambda b, r: (0, 0)),
                pl.BlockSpec((k, wide), lambda b, r: (0, 0)),
            ],
            # lane-dense (C, rows) block written straight into flat NCHW output
            out_specs=pl.BlockSpec((None, C, rows), lambda b, r: (b, 0, r)),
        ),
        compiler_params=pltpu.CompilerParams(
            dimension_semantics=("parallel", "parallel")),
    )(xz_seg, w_cat, prm, col_mask)

    return out_flat.reshape(B, C, H, W)             # pure metadata reshape


# ----------------------------------------------------------------------------
# Pure-JAX f32 reference (lax.conv in NCHW, matches PyTorch semantics).
# ----------------------------------------------------------------------------
def ghu_reference(x, z, params, *, num_channels):
    C = num_channels

    def conv(inp, w, b):
        dn = lax.conv_dimension_numbers(inp.shape, w.shape,
                                        ("NCHW", "OIHW", "NCHW"))
        return lax.conv_general_dilated(inp, w, (1, 1), "SAME",
                                        dimension_numbers=dn) + b[None, :, None, None]

    def ln_channels(t, gamma, beta):
        tn = jnp.transpose(t, (0, 2, 3, 1))              # NHWC
        mu = jnp.mean(tn, axis=-1, keepdims=True)
        var = jnp.mean((tn - mu) ** 2, axis=-1, keepdims=True)
        tn = (tn - mu) * lax.rsqrt(var + LN_EPS) * gamma + beta
        return jnp.transpose(tn, (0, 3, 1, 2))

    x_cat = ln_channels(conv(x, params["wx"], params["bx"]),
                        params["gamma_x"], params["beta_x"])
    z_cat = ln_channels(conv(z, params["wz"], params["bz"]),
                        params["gamma_z"], params["beta_z"])
    gates = x_cat + z_cat
    p, u = gates[:, :C], gates[:, C:]
    p = jnp.tanh(p)
    u = jax.nn.sigmoid(u)
    return u * p + (1.0 - u) * z


# ----------------------------------------------------------------------------
if __name__ == "__main__":
    B, C, H, W = 2, 4, 16, 16
    filter_size = 3
    init_val = 0.001

    key = jax.random.PRNGKey(0)
    k_x, k_z, k_wx, k_wz, k_bx, k_bz, k_gx, k_btx, k_gz, k_btz = \
        jax.random.split(key, 10)

    x = jax.random.normal(k_x, (B, C, H, W), dtype=jnp.float32)
    z = jax.random.normal(k_z, (B, C, H, W), dtype=jnp.float32)

    fan_in = C * filter_size * filter_size
    bbound = 1.0 / jnp.sqrt(fan_in)  # PyTorch Conv2d default bias init range
    params = {
        "wx": jax.random.uniform(k_wx, (2 * C, C, filter_size, filter_size),
                                 minval=-init_val, maxval=init_val,
                                 dtype=jnp.float32),
        "wz": jax.random.uniform(k_wz, (2 * C, C, filter_size, filter_size),
                                 minval=-init_val, maxval=init_val,
                                 dtype=jnp.float32),
        "bx": jax.random.uniform(k_bx, (2 * C,), minval=-bbound, maxval=bbound,
                                 dtype=jnp.float32),
        "bz": jax.random.uniform(k_bz, (2 * C,), minval=-bbound, maxval=bbound,
                                 dtype=jnp.float32),
        "gamma_x": 1.0 + 0.1 * jax.random.normal(k_gx, (2 * C,), jnp.float32),
        "beta_x": 0.1 * jax.random.normal(k_btx, (2 * C,), jnp.float32),
        "gamma_z": 1.0 + 0.1 * jax.random.normal(k_gz, (2 * C,), jnp.float32),
        "beta_z": 0.1 * jax.random.normal(k_btz, (2 * C,), jnp.float32),
    }

    z_ref = ghu_reference(x, z, params, num_channels=C)

    # auto tile (tile_h=8 -> grid (2, 2), lane-dense rows=128, 4 pipeline steps)
    # and explicit whole-image tile (tile_h=16 -> grid (2, 1), no-copy R==1 path).
    # Tolerance relaxed vs the all-f32 version because the streamed slab and
    # conv weights are bf16 (accumulation / LN / gating remain f32).
    for th in (None, H):
        z_new = ghu_forward(x, z, params, filter_size=filter_size,
                            num_channels=C, tile_h=th)
        z_new = jax.block_until_ready(z_new)
        assert z_new.shape == (B, C, H, W)
        err = float(jnp.max(jnp.abs(z_new - z_ref)))
        assert jnp.allclose(z_new, z_ref, atol=2e-2, rtol=2e-2), err

    print("KERNEL_OK")
</pallas_src>

<mosaic_0001>
module attributes {stable_mosaic.version = 11 : i64} {
  func.func @ghu_kernel(%arg0: i32, %arg1: i32, %arg2: memref<1x1x8x162xbf16, #tpu.memory_space<vmem>>, %arg3: memref<3x16x24xbf16, #tpu.memory_space<vmem>>, %arg4: memref<16x3xf32, #tpu.memory_space<vmem>>, %arg5: memref<3x160xbf16, #tpu.memory_space<vmem>>, %arg6: memref<1x4x128xf32, #tpu.memory_space<vmem>>) attributes {dimension_semantics = [#tpu.dimension_semantics<parallel>, #tpu.dimension_semantics<parallel>], iteration_bounds = array<i64: 2, 2>, scalar_prefetch = 0 : i64, scratch_operands = 0 : i64, tpu.core_type = #tpu.core_type<tc>, window_params = [{transform_indices = @transform_0, window_bounds = array<i64: 1, 1, 8, 162>}, {pipeline_mode = #tpu.pipeline_mode<synchronous>, transform_indices = @transform_1, window_bounds = array<i64: 3, 16, 24>}, {pipeline_mode = #tpu.pipeline_mode<synchronous>, transform_indices = @transform_2, window_bounds = array<i64: 16, 3>}, {pipeline_mode = #tpu.pipeline_mode<synchronous>, transform_indices = @transform_3, window_bounds = array<i64: 3, 160>}, {transform_indices = @transform_4, window_bounds = array<i64: 1, 4, 128>}]} {
    %c0 = arith.constant 0 : index
    %c0_0 = arith.constant 0 : index
    %c0_1 = arith.constant 0 : index
    %c0_2 = arith.constant 0 : index
    %0 = vector.load %arg2[%c0, %c0_0, %c0_1, %c0_2] : memref<1x1x8x162xbf16, #tpu.memory_space<vmem>>, vector<1x1x8x160xbf16>
    %1 = vector.shape_cast %0 : vector<1x1x8x160xbf16> to vector<8x160xbf16>
    %c0_3 = arith.constant 0 : index
    %c0_4 = arith.constant 0 : index
    %2 = vector.load %arg5[%c0_3, %c0_4] : memref<3x160xbf16, #tpu.memory_space<vmem>>, vector<1x160xbf16>
    %3 = vector.broadcast %2 : vector<1x160xbf16> to vector<8x160xbf16>
    %4 = arith.mulf %1, %3 : vector<8x160xbf16>
    %c0_5 = arith.constant 0 : index
    %c0_6 = arith.constant 0 : index
    %c0_7 = arith.constant 0 : index
    %c1 = arith.constant 1 : index
    %5 = vector.load %arg2[%c0_5, %c0_6, %c0_7, %c1] : memref<1x1x8x162xbf16, #tpu.memory_space<vmem>>, vector<1x1x8x160xbf16>
    %6 = vector.shape_cast %5 : vector<1x1x8x160xbf16> to vector<8x160xbf16>
    %c0_8 = arith.constant 0 : index
    %c0_9 = arith.constant 0 : index
    %c0_10 = arith.constant 0 : index
    %c2 = arith.constant 2 : index
    %7 = vector.load %arg2[%c0_8, %c0_9, %c0_10, %c2] : memref<1x1x8x162xbf16, #tpu.memory_space<vmem>>, vector<1x1x8x160xbf16>
    %8 = vector.shape_cast %7 : vector<1x1x8x160xbf16> to vector<8x160xbf16>
    %c2_11 = arith.constant 2 : index
    %c0_12 = arith.constant 0 : index
    %9 = vector.load %arg5[%c2_11, %c0_12] : memref<3x160xbf16, #tpu.memory_space<vmem>>, vector<1x160xbf16>
    %10 = vector.broadcast %9 : vector<1x160xbf16> to vector<8x160xbf16>
    %11 = arith.mulf %8, %10 : vector<8x160xbf16>
    %12 = tpu.concatenate %4, %6, %11 in 0 : vector<8x160xbf16>, vector<8x160xbf16>, vector<8x160xbf16> -> vector<24x160xbf16>
    %c0_13 = arith.constant 0 : index
    %c0_14 = arith.constant 0 : index
    %c0_15 = arith.constant 0 : index
    %13 = vector.load %arg3[%c0_13, %c0_14, %c0_15] : memref<3x16x24xbf16, #tpu.memory_space<vmem>>, vector<1x16x24xbf16>
    %14 = vector.shape_cast %13 : vector<1x16x24xbf16> to vector<16x24xbf16>
    %15 = vector.extract_strided_slice %12 {offsets = [0, 0], sizes = [24, 128], strides = [1, 1]} : vector<24x160xbf16> to vector<24x128xbf16>
    %cst = arith.constant dense<0.000000e+00> : vector<16x128xf32>
    %16 = tpu.matmul %14, %15, %cst {dimension_numbers = #tpu.dot_dimension_numbers<[1], [0], [0], [1], [0, 0, 1, 1], [], []>} : vector<16x24xbf16>, vector<24x128xbf16>, vector<16x128xf32> -> vector<16x128xf32>
    %c1_16 = arith.constant 1 : index
    %c0_17 = arith.constant 0 : index
    %c0_18 = arith.constant 0 : index
    %17 = vector.load %arg3[%c1_16, %c0_17, %c0_18] : memref<3x16x24xbf16, #tpu.memory_space<vmem>>, vector<1x16x24xbf16>
    %18 = vector.shape_cast %17 : vector<1x16x24xbf16> to vector<16x24xbf16>
    %19 = vector.extract_strided_slice %12 {offsets = [0, 16], sizes = [24, 128], strides = [1, 1]} : vector<24x160xbf16> to vector<24x128xbf16>
    %cst_19 = arith.constant dense<0.000000e+00> : vector<16x128xf32>
    %20 = tpu.matmul %18, %19, %cst_19 {dimension_numbers = #tpu.dot_dimension_numbers<[1], [0], [0], [1], [0, 0, 1, 1], [], []>} : vector<16x24xbf16>, vector<24x128xbf16>, vector<16x128xf32> -> vector<16x128xf32>
    %21 = arith.addf %16, %20 : vector<16x128xf32>
    %c2_20 = arith.constant 2 : index
    %c0_21 = arith.constant 0 : index
    %c0_22 = arith.constant 0 : index
    %22 = vector.load %arg3[%c2_20, %c0_21, %c0_22] : memref<3x16x24xbf16, #tpu.memory_space<vmem>>, vector<1x16x24xbf16>
    %23 = vector.shape_cast %22 : vector<1x16x24xbf16> to vector<16x24xbf16>
    %24 = vector.extract_strided_slice %12 {offsets = [0, 32], sizes = [24, 128], strides = [1, 1]} : vector<24x160xbf16> to vector<24x128xbf16>
    %cst_23 = arith.constant dense<0.000000e+00> : vector<16x128xf32>
    %25 = tpu.matmul %23, %24, %cst_23 {dimension_numbers = #tpu.dot_dimension_numbers<[1], [0], [0], [1], [0, 0, 1, 1], [], []>} : vector<16x24xbf16>, vector<24x128xbf16>, vector<16x128xf32> -> vector<16x128xf32>
    %26 = arith.addf %21, %25 : vector<16x128xf32>
    %c0_24 = arith.constant 0 : index
    %c0_25 = arith.constant 0 : index
    %27 = vector.load %arg4[%c0_24, %c0_25] : memref<16x3xf32, #tpu.memory_space<vmem>>, vector<16x1xf32>
    %28 = vector.broadcast %27 : vector<16x1xf32> to vector<16x128xf32>
    %29 = arith.addf %26, %28 : vector<16x128xf32>
    %c0_26 = arith.constant 0 : index
    %c1_27 = arith.constant 1 : index
    %30 = vector.load %arg4[%c0_26, %c1_27] : memref<16x3xf32, #tpu.memory_space<vmem>>, vector<16x1xf32>
    %c0_28 = arith.constant 0 : index
    %c2_29 = arith.constant 2 : index
    %31 = vector.load %arg4[%c0_28, %c2_29] : memref<16x3xf32, #tpu.memory_space<vmem>>, vector<8x1xf32>
    %32 = vector.extract_strided_slice %29 {offsets = [0, 0], sizes = [8, 128], strides = [1, 1]} : vector<16x128xf32> to vector<8x128xf32>
    %cst_30 = arith.constant dense<0.000000e+00> : vector<128xf32>
    %33 = vector.multi_reduction <add>, %32, %cst_30 [0] : vector<8x128xf32> to vector<128xf32>
    %34 = vector.shape_cast %33 : vector<128xf32> to vector<1x128xf32>
    %cst_31 = arith.constant 8.000000e+00 : f32
    %35 = vector.broadcast %cst_31 : f32 to vector<1x128xf32>
    %36 = arith.divf %34, %35 : vector<1x128xf32>
    %37 = vector.broadcast %36 : vector<1x128xf32> to vector<8x128xf32>
    %38 = arith.subf %32, %37 : vector<8x128xf32>
    %39 = vector.broadcast %36 : vector<1x128xf32> to vector<8x128xf32>
    %40 = arith.subf %32, %39 : vector<8x128xf32>
    %41 = arith.mulf %38, %40 : vector<8x128xf32>
    %cst_32 = arith.constant dense<0.000000e+00> : vector<128xf32>
    %42 = vector.multi_reduction <add>, %41, %cst_32 [0] : vector<8x128xf32> to vector<128xf32>
    %43 = vector.shape_cast %42 : vector<128xf32> to vector<1x128xf32>
    %cst_33 = arith.constant 8.000000e+00 : f32
    %44 = vector.broadcast %cst_33 : f32 to vector<1x128xf32>
    %45 = arith.divf %43, %44 : vector<1x128xf32>
    %46 = vector.broadcast %36 : vector<1x128xf32> to vector<8x128xf32>
    %47 = arith.subf %32, %46 : vector<8x128xf32>
    %cst_34 = arith.constant 9.99999974E-6 : f32
    %48 = vector.broadcast %cst_34 : f32 to vector<1x128xf32>
    %49 = arith.addf %45, %48 : vector<1x128xf32>
    %50 = math.rsqrt %49 : vector<1x128xf32>
    %51 = vector.broadcast %50 : vector<1x128xf32> to vector<8x128xf32>
    %52 = arith.mulf %47, %51 : vector<8x128xf32>
    %53 = vector.extract_strided_slice %30 {offsets = [0, 0], sizes = [8, 1], strides = [1, 1]} : vector<16x1xf32> to vector<8x1xf32>
    %54 = vector.broadcast %53 : vector<8x1xf32> to vector<8x128xf32>
    %55 = arith.mulf %52, %54 : vector<8x128xf32>
    %56 = vector.extract_strided_slice %29 {offsets = [8, 0], sizes = [8, 128], strides = [1, 1]} : vector<16x128xf32> to vector<8x128xf32>
    %cst_35 = arith.constant dense<0.000000e+00> : vector<128xf32>
    %57 = vector.multi_reduction <add>, %56, %cst_35 [0] : vector<8x128xf32> to vector<128xf32>
    %58 = vector.shape_cast %57 : vector<128xf32> to vector<1x128xf32>
    %cst_36 = arith.constant 8.000000e+00 : f32
    %59 = vector.broadcast %cst_36 : f32 to vector<1x128xf32>
    %60 = arith.divf %58, %59 : vector<1x128xf32>
    %61 = vector.broadcast %60 : vector<1x128xf32> to vector<8x128xf32>
    %62 = arith.subf %56, %61 : vector<8x128xf32>
    %63 = vector.broadcast %60 : vector<1x128xf32> to vector<8x128xf32>
    %64 = arith.subf %56, %63 : vector<8x128xf32>
    %65 = arith.mulf %62, %64 : vector<8x128xf32>
    %cst_37 = arith.constant dense<0.000000e+00> : vector<128xf32>
    %66 = vector.multi_reduction <add>, %65, %cst_37 [0] : vector<8x128xf32> to vector<128xf32>
    %67 = vector.shape_cast %66 : vector<128xf32> to vector<1x128xf32>
    %cst_38 = arith.constant 8.000000e+00 : f32
    %68 = vector.broadcast %cst_38 : f32 to vector<1x128xf32>
    %69 = arith.divf %67, %68 : vector<1x128xf32>
    %70 = vector.broadcast %60 : vector<1x128xf32> to vector<8x128xf32>
    %71 = arith.subf %56, %70 : vector<8x128xf32>
    %cst_39 = arith.constant 9.99999974E-6 : f32
    %72 = vector.broadcast %cst_39 : f32 to vector<1x128xf32>
    %73 = arith.addf %69, %72 : vector<1x128xf32>
    %74 = math.rsqrt %73 : vector<1x128xf32>
    %75 = vector.broadcast %74 : vector<1x128xf32> to vector<8x128xf32>
    %76 = arith.mulf %71, %75 : vector<8x128xf32>
    %77 = vector.extract_strided_slice %30 {offsets = [8, 0], sizes = [8, 1], strides = [1, 1]} : vector<16x1xf32> to vector<8x1xf32>
    %78 = vector.broadcast %77 : vector<8x1xf32> to vector<8x128xf32>
    %79 = arith.mulf %76, %78 : vector<8x128xf32>
    %80 = arith.addf %55, %79 : vector<8x128xf32>
    %81 = vector.broadcast %31 : vector<8x1xf32> to vector<8x128xf32>
    %82 = arith.addf %80, %81 : vector<8x128xf32>
    %83 = vector.extract_strided_slice %82 {offsets = [0, 0], sizes = [4, 128], strides = [1, 1]} : vector<8x128xf32> to vector<4x128xf32>
    %84 = math.tanh %83 : vector<4x128xf32>
    %85 = vector.extract_strided_slice %82 {offsets = [4, 0], sizes = [4, 128], strides = [1, 1]} : vector<8x128xf32> to vector<4x128xf32>
    %86 = arith.negf %85 : vector<4x128xf32>
    %87 = math.exp %86 : vector<4x128xf32>
    %cst_40 = arith.constant 1.000000e+00 : f32
    %88 = vector.broadcast %cst_40 : f32 to vector<4x128xf32>
    %89 = arith.addf %88, %87 : vector<4x128xf32>
    %90 = arith.divf %88, %89 : vector<4x128xf32>
    %c0_41 = arith.constant 0 : index
    %c0_42 = arith.constant 0 : index
    %c4 = arith.constant 4 : index
    %c17 = arith.constant 17 : index
    %91 = vector.load %arg2[%c0_41, %c0_42, %c4, %c17] : memref<1x1x8x162xbf16, #tpu.memory_space<vmem>>, vector<1x1x4x128xbf16>
    %92 = vector.shape_cast %91 : vector<1x1x4x128xbf16> to vector<4x128xbf16>
    %93 = arith.extf %92 : vector<4x128xbf16> to vector<4x128xf32>
    %94 = arith.subf %84, %93 : vector<4x128xf32>
    %95 = arith.mulf %90, %94 : vector<4x128xf32>
    %96 = arith.addf %93, %95 : vector<4x128xf32>
    %c0_43 = arith.constant 0 : index
    %c0_44 = arith.constant 0 : index
    %c0_45 = arith.constant 0 : index
    %97 = vector.load %arg6[%c0_43, %c0_44, %c0_45] : memref<1x4x128xf32, #tpu.memory_space<vmem>>, vector<1x4x128xf32>
    %98 = vector.shape_cast %97 : vector<1x4x128xf32> to vector<4x128xf32>
    %99 = vector.shape_cast %96 : vector<4x128xf32> to vector<1x4x128xf32>
    tpu.vector_store %arg6[%c0_43, %c0_44, %c0_45], %99 {strides = array<i32>} : memref<1x4x128xf32, #tpu.memory_space<vmem>>, vector<1x4x128xf32>,
    return
  }
  func.func @transform_0(%arg0: i32, %arg1: i32) -> (i32, i32, i32, i32) {
    %c0_i32 = arith.constant 0 : i32
    %c0_i32_0 = arith.constant 0 : i32
    %c0_i32_1 = arith.constant 0 : i32
    return %arg0, %arg1, %c0_i32, %c0_i32_0 : i32, i32, i32, i32
  }
  func.func @transform_1(%arg0: i32, %arg1: i32) -> (i32, i32, i32) {
    %c0_i32 = arith.constant 0 : i32
    %c0_i32_0 = arith.constant 0 : i32
    %c0_i32_1 = arith.constant 0 : i32
    %c0_i32_2 = arith.constant 0 : i32
    return %c0_i32, %c0_i32_0, %c0_i32_1 : i32, i32, i32
  }
  func.func @transform_2(%arg0: i32, %arg1: i32) -> (i32, i32) {
    %c0_i32 = arith.constant 0 : i32
    %c0_i32_0 = arith.constant 0 : i32
    %c0_i32_1 = arith.constant 0 : i32
    return %c0_i32, %c0_i32_0 : i32, i32
  }
  func.func @transform_3(%arg0: i32, %arg1: i32) -> (i32, i32) {
    %c0_i32 = arith.constant 0 : i32
    %c0_i32_0 = arith.constant 0 : i32
    %c0_i32_1 = arith.constant 0 : i32
    return %c0_i32, %c0_i32_0 : i32, i32
  }
  func.func @transform_4(%arg0: i32, %arg1: i32) -> (i32, i32, i32) {
    %c0_i32 = arith.constant 0 : i32
    %c0_i32_0 = arith.constant 0 : i32
    return %arg0, %c0_i32, %arg1 : i32, i32, i32
  }
}

</mosaic_0001>

<bundles_post_ra>
// kernel: tpu_custom_call.1
= control target key start
LH: loop header
LB: loop body
LE: loop exit
PB: predicated region body
PF: predicated region fallthrough
CT: control target
= control target key end

     0   :  { %s1461_s0 = inlined_call_operand.hbm [shape: bf16[2,2,8,162], index: 0, kind: input, shape index: {}]   ;;  %s1462_s1 = inlined_call_operand.hbm [shape: bf16[3,16,24], index: 1, kind: input, shape index: {}]   ;;  %s1463_s2 = inlined_call_operand.vmem [shape: f32[16,3], index: 2, kind: input, shape index: {}]   ;;  %s1464_s3 = inlined_call_operand.vmem [shape: bf16[3,160], index: 3, kind: input, shape index: {}]   ;;  %s1465_s4 = inlined_call_operand.hbm [shape: f32[2,4,256], index: 4, kind: output, shape index: {}]  }
   0x1   :  { %1475 = sst [smem:[#allocation16_spill]] %s1462_s1 }
   0x2   :  { %9 = vsyncpa [#allocation3], 0 }
   0x3   :  { %11 = vsyncpa [#allocation3 + $0x1], 0 }
   0x4   :  { %12 = vsyncpa [#allocation6], 0 }
   0x5   :  { %13 = vsyncpa [#allocation4], 0 }
   0x6   :  { %15 = vsyncpa [#allocation4 + $0x1], 0  ;;  %s1167_s15 = smov 0   ;;  %s1169_s16 = smov 0  }
   0x7   :  { %s1171_s17 = smov 0   ;;  %s1173_s18 = smov 0  }
   0x8   :  { %s1175_s19 = smov 0   ;;  %s1177_s20 = smov 0  }
   0x9   :  { %s1179_s21 = smov 0   ;;  %s1181_s22 = smov 0  }
   0xa LB: > { %1476 = sst [smem:[#allocation11_spill]] %s1095_s15  ;;  %s768_s23 = sadd.s32 4294967295, %s1123_s22   ;;  %s1123_s22 = sphi %s1181_s22, %s21_s22   ;;  %s1119_s21 = sphi %s1179_s21, %s1505_s21   ;;  %s1115_s20 = sphi %s1177_s20, %s1499_s20   ;;  %s1111_s19 = sphi %s1175_s19, %s1504_s19   ;;  %s1107_s18 = sphi %s1173_s18, %s1498_s18   ;;  %s1103_s17 = sphi %s1171_s17, %s1503_s17   ;;  %s1099_s16 = sphi %s1169_s16, %s1502_s16   ;;  %s1095_s15 = sphi %s1167_s15, %s1501_s15  }
   0xb   : > { %1477 = sst [smem:[#allocation12_spill]] %s1115_s20  ;;  %s769_s24 = sadd.s32 4294967294, %s1123_s22  }
   0xc   : > { %p55_p0 = scmp.ne.s32.totalorder %s1099_s16, %s1095_s15  ;;  %p1211_p1 = scmp.eq.s32.totalorder %s768_s23, 0 }
   0xd   : > { %p1215_p2 = scmp.eq.s32.totalorder %s768_s23, 3  ;;  %p150_p3 = scmp.eq.s32.totalorder %s769_s24, 3 }
   0xe   : > { %s1478_s25 = scalar_select %p1211_p1, 1, 0 }
   0xf   : > { %s1479_s26 = scalar_select %p1215_p2, 1, 0 }
  0x10   : > { %p1221_p4 = por %p1211_p1, %p55_p0  ;;  %p770_p5 = scmp.ge.s32.totalorder %s1123_s22, 1 }
  0x11   : > { %p1226_p6 = por %p150_p3, %p55_p0  ;;  %p157_p7 = scmp.lt.s32.totalorder %s1123_s22, 5 }
  0x12   : > { %s1480_s27 = scalar_select %p1221_p4, 1, 0 }
  0x13   : > { %s1481_s28 = scalar_select %p1226_p6, 1, 0 }
  0x14   : > { %p1231_p8 = pnand %p770_p5, %p157_p7  ;;  %s1125_s30 = smov [#allocation5]  }
  0x15   : > { %1482 = sst [smem:[#allocation13_spill]] %s1481_s28  ;;  %s169_s5 = sshll.u32 %s1125_s30, 4  ;;  %s170_s5 = int_to_ptr.vmem [resolvable:$true] %s169_s5 }
  0x16   : > { %s1483_s29 = scalar_select %p1231_p8, 1, 0 }
  0x17   : > { %p844_p9 = pneg %p1231_p8  ;;  %s1485_s1 = sld [smem:[#allocation16_spill]] }
  0x19   : > { %p1239_p10 = pnand %p844_p9, %p1211_p1 }
  0x1b   : > { %p965_p12 = pneg %p1239_p10 }
  0x1d   : > { %s963_s9 = scalar_lea.hbm %s1485_s1, 384 }
  0x1e   : > { %p964_p11 = scmp.ne.s32.totalorder %s1485_s1, %s963_s9  ;;  %p970_p3 = scmp.lt.u32.totalorder %s963_s9, %s1485_s1 }
  0x20   : > { %p966_p13 = pnand %p965_p12, %p964_p11 }
  0x22   : > { %p967_p0 = pneg %p966_p13 }
  0x24   : > { %p972_p5 = pnand %p970_p3, %p967_p0 }
  0x26   : > { %975 = shalt.err (!%p972_p5)
}
  0x27   : > { %s976_s14 = scalar_lea.vmem %s170_s5, 384  ;;  %p984_p1 = scmp.lt.s32.totalorder %s170_s5, %s170_s5 }
  0x28   : > { %p977_p7 = scmp.ne.s32.totalorder %s170_s5, %s976_s14  ;;  %p985_p4 = scmp.lt.s32.totalorder %s976_s14, %s976_s14 }
  0x2a   : > { %p979_p9 = pnand %p977_p7, %p965_p12  ;;  %p986_p8 = por %p985_p4, %p984_p1 }
  0x2c   : > { %p980_p6 = pneg %p979_p9 }
  0x2e   : > { %p987_p2 = pnand %p986_p8, %p980_p6 }
  0x30   : > { %990 = shalt.err (!%p987_p2)
}
  0x31   : > { %s1126_s23 = smov 64   ;;  %s1127_s24 = smov 4  }
  0x32   : > { %847 = dma.hbm_to_vmem [thread:$0]  (!%p1239_p10), %s1485_s1, 384, %s170_s5, [#allocation6], %s1126_s23, %s1126_s23, %s1127_s24  }
  0x33   : > { %s30_s8 = sadd.s32 1, %s1115_s20  ;;  %s33_s9 = sadd.s32 1, %s1119_s21 }
  0x34   : > { %p31_p1 = scmp.ge.s32.totalorder %s30_s8, 2  ;;  %s42_s10 = sadd.s32 1, %s1103_s17 }
  0x35   : > { %p49_p2 = scmp.ne.s32.totalorder %s1103_s17, %s1099_s16  ;;  %p50_p4 = scmp.eq.s32.totalorder %s1123_s22, 0 }
  0x36   : > { %s1507_s8 = smov (%p31_p1, %s30_s8), 0  ;;  %s1509_s9 = smov (!%p31_p1, %s33_s9), %s1119_s21 }
  0x37   : > { %1486 = sst [smem:[#allocation14_spill]] %s1507_s8  ;;  %s38_s11 = ssub.s32 %s1115_s20, %s1507_s8 }
  0x38   : > { %p35_p6 = scmp.ge.s32.totalorder %s1509_s9, 2  ;;  %p1487_p8 = scmp.ne.s32.totalorder %s1479_s26, 0 }
  0x39   : > { %p1276_p10 = por %p50_p4, %p49_p2  ;;  %p857_p12 = scmp.lt.s32.totalorder %s1123_s22, 4 }
  0x3a   : > { %p1272_p11 = por %p1487_p8, %p49_p2  ;;  %s1511_s9 = smov (%p35_p6, %s1509_s9), 0 }
  0x3b   : > { %1490 = sst [smem:[#allocation15_spill]] %s1511_s9  ;;  %s189_s12 = sand.u32 1, %s1103_s17  }
  0x3c   : > { %s774_s13 = sshll.u32 %s1115_s20, 1  ;;  %s37_s14 = ssub.s32 %s1119_s21, %s1511_s9 }
  0x3d   : > { %s39_s23 = sor.u32 %s38_s11, %s37_s14  ;;  %s773_s24 = sshll.u32 %s189_s12, 3 }
  0x3e   : > { %p40_p13 = scmp.eq.s32.totalorder %s39_s23, 0  ;;  %s775_s26 = sshll.u32 %s1119_s21, 2 }
  0x3f   : > { %s193_s30 = scalar_lea.vmem [#allocation2], %s773_s24  ;;  %s199_s8 = sadd.s32 %s775_s26, %s774_s13 }
  0x40   : > { %s203_s7 = sshll.u32 %s193_s30, 4  ;;  %s776_s28 = sshll.u32 %s199_s8, 6  ;;  %s1291_s7 = int_to_ptr.vmem [resolvable:$true] %s203_s7 }
  0x41   : > { %s1289_s1 = scalar_select %p40_p13, %s1103_s17, %s42_s10  }
  0x42   : > { %p1297_p0 = pnand %p857_p12, %p1276_p10  ;;  %s1304_s11 = scalar_lea.hbm %s1461_s0, %s776_s28 }
  0x43   : > { %s190_s10 = scalar_lea.sflag [#allocation3], %s189_s12  ;;  %s991_s13 = scalar_lea.hbm %s1304_s11, 128 }
  0x44   : > { %p992_p3 = scmp.ne.s32.totalorder %s1304_s11, %s991_s13  ;;  %p993_p5 = pneg %p1297_p0 }
  0x45   : > { %s996_s20 = scalar_lea.hbm %s1461_s0, 512  ;;  %p997_p1 = scmp.lt.u32.totalorder %s1304_s11, %s1461_s0 }
  0x46   : > { %p994_p7 = pnand %p993_p5, %p992_p3  ;;  %p998_p2 = scmp.lt.u32.totalorder %s996_s20, %s991_s13 }
  0x47   : > { %p1000_p6 = scmp.lt.u32.totalorder %s991_s13, %s1304_s11 }
  0x48   : > { %p995_p9 = pneg %p994_p7  ;;  %p999_p4 = por %p998_p2, %p997_p1 }
  0x4a   : > { %p1001_p8 = por %p1000_p6, %p999_p4 }
  0x4c   : > { %p1002_p10 = pnand %p1001_p8, %p995_p9 }
  0x4e   : > { %1005 = shalt.err (!%p1002_p10)
}
  0x4f   : > { %s1006_s12 = scalar_lea.vmem %s1291_s7, 128  ;;  %s1128_s14 = smov [#allocation2]  }
  0x50   : > { %p1007_p12 = scmp.ne.s32.totalorder %s1291_s7, %s1006_s12  ;;  %s1011_s23 = sshll.u32 %s1128_s14, 4  ;;  %s1012_s23 = int_to_ptr.vmem [resolvable:$false] %s1011_s23 }
  0x51   : > { %s1013_s24 = scalar_lea.vmem %s1012_s23, 256  ;;  %p1014_p7 = scmp.lt.s32.totalorder %s1291_s7, %s1012_s23 }
  0x52   : > { %p1009_p13 = pnand %p1007_p12, %p993_p5  ;;  %p1015_p1 = scmp.lt.s32.totalorder %s1013_s24, %s1006_s12 }
  0x54   : > { %p1010_p3 = pneg %p1009_p13  ;;  %p1016_p2 = por %p1015_p1, %p1014_p7 }
  0x56   : > { %p1017_p4 = pnand %p1016_p2, %p1010_p3 }
  0x58   : > { %1020 = shalt.err (!%p1017_p4)
}
  0x59   : > { %851 = dma.hbm_to_vmem [thread:$0]  (!%p1297_p0), %s1304_s11, 128, %s1291_s7, %s190_s10  }
  0x5a   : > { %p1492_p9 = scmp.ne.s32.totalorder %s1483_s29, 0 }
  0x5b   : > { %s1334_s26 = sand.u32 (!%p1492_p9), 1, %s1099_s16   ;;  %p1493_p5 = scmp.ne.s32.totalorder (!%p1492_p9), %s1480_s27, 0 }
  0x5c   : > { %212 = sbr.rel (%p1492_p9) target bundleno = 1025 (0x401), region = 36  ;;  %s778_s30 = sshll.u32 (!%p1492_p9), %s1334_s26, 3 }
  0x5d   : > { %s215_s13 = scalar_lea.sflag (!%p1492_p9), [#allocation3], %s1334_s26  ;;  %s1338_s8 = scalar_lea.vmem (!%p1492_p9), [#allocation2], %s778_s30 }
  0x63   : > { %1082 = dma.done.wait (%p1493_p5), %s215_s13, 128  }
  0x64   : > { %1084 = vsyncadd (%p1493_p5), %s215_s13, 4294967168  ;;  %p1494_p0 = scmp.ne.s32.totalorder %s1478_s25, 0 }
  0x66   : > { %1086 = dma.done.wait (%p1494_p0), [#allocation6], 384  }
  0x67   : > { %1088 = vsyncadd (%p1494_p0), [#allocation6], 4294966912  ;;  %v262_v0 = vlaneseq  ;;  %v783_v3 = vld.sshfl [vmem:[%s1464_s3] sm:$0x22 pattern:$0x76325410] }
  0x68   : > { %v248_v4 = vld [vmem:[%s1338_s8] sm:$0xff]  ;;  %v289_v5 = vcombine.high %v783_v3, %v783_v3  ;;  %v291_v6 = vpack.i.b16 %v783_v3, %v783_v3  ;;  %s1129_s27 = smov 127   ;;  %v1130_v10 = vmov 0.0   ;;  %s1131_s25 = smov 2   ;;  %vm312_vm0 = vcmask 15360   ;;  %v951_v40 = vld [vmem:[#allocation5] sm:$0xff]  }
  0x69   : > { %v263_v1 = vshrl.u32 %v262_v0, 7  ;;  %v788_v7 = vcombine.high %v248_v4, %v248_v4  ;;  %820 = vmatprep.subr.bf16.mxu1 %v1130_v10  ;;  %812 = vmatprep.subr.bf16.mxu0 %v1130_v10  ;;  %v787_v13 = vcombine.low %v248_v4, %v248_v4  ;;  %v781_v14 = vld.sshfl [vmem:[%s1464_s3] sm:$0x11 pattern:$0x76325410]  ;;  %vm330_vm1 = vcmask 1039360  }
  0x6a   : > { %v298_v9 = vpack.i.b16 %v289_v5, %v289_v5  ;;  %v258_v15 = vcombine.high %v781_v14, %v781_v14  ;;  %v260_v17 = vpack.i.b16 %v781_v14, %v781_v14  ;;  %vm343_vm2 = vcmask 1043456   ;;  %s1132_s10 = smov 126   ;;  %s1133_s5 = smov 112   ;;  %v545_v45 = vld [vmem:[%s1463_s2 + $0x8] sm:$0xff]  ;;  %v544_v46 = vld [vmem:[%s1463_s2] sm:$0xff]  ;;  %v950_v59 = vld [vmem:[#allocation5 + $0x8] sm:$0xff]  }
  0x6b   : > { %v295_v2 = vsub.s32 1, %v263_v1  ;;  %328 = vrot.lane.b32.xlu1 %v788_v7, %s1129_s27  ;;  %v264_v16 = vsub.s32 0, %v263_v1  ;;  %vm1134_vm3 = vmmov 0   ;;  %vm341_vm4 = vcmask 1031168   ;;  %s1136_s20 = smov 96   ;;  %s1139_s23 = smov 111  }
  0x6c   : > { %v267_v18 = vpack.i.b16 %v258_v15, %v258_v15  ;;  %816 = vmatprep.mubr.msk.bf16.mxu0 %vm1134_vm3, %v1130_v10  ;;  %824 = vmatprep.mubr.msk.bf16.mxu1 %vm1134_vm3, %v1130_v10  ;;  %vm371_vm5 = vcmask 916480   ;;  %v1135_v41 = vmov 0   ;;  %vm375_vm6 = vcmask 195584   ;;  %v1375_v47 = vld [vmem:[%s1338_s8] sm:$0xcc]  ;;  %s1140_s24 = smov 17  }
  0x6d   : > { %v296_v8 = vrot.slane %v291_v6, %v295_v2  ;;  %v303_v11 = vrot.slane %v298_v9, %v295_v2  ;;  %v265_v19 = vrot.slane %v260_v17, %v264_v16  ;;  %939 = vset.pattern.permute.xlu1 %v1135_v41  ;;  %940 = vset.pattern.permute.xlu0 %v1135_v41  ;;  %v623_v48 = vunpack.c.l.bf16 %v1375_v47  ;;  %v952_v3 = vld [vmem:[#allocation5 + $0x10] sm:$0xff]   ;;  %s780_s30 = sshll.u32 %s1334_s26, 2  ;;  %s799_s13 = sshll.u32 %s1111_s19, 1 }
  0x6e   : > { %v272_v20 = vrot.slane %v267_v18, %v264_v16  ;;  %v624_v49 = vunpack.c.h.bf16 %v1375_v47  ;;  %v1137_v50 = vmov 2   ;;  %v1138_v51 = vmov 1   ;;  %s668_s8 = sadd.s32 %s1107_s18, %s799_s13  ;;  %s246_s29 = scalar_lea.vmem [#allocation7], %s780_s30 }
  0x6f   : > { %v784_v12 = vcombine.low %v296_v8, %v303_v11  ;;  %v627_v52 = vrot.slane %v623_v48, 4  ;;  %vm491_vm7 = vcmask 785408   ;;  %vm633_vm8 = vcmask 908288   ;;  %s800_s15 = sshll.u32 %s668_s8, 6  ;;  %s657_s19 = scalar_lea.sflag [#allocation4], %s1334_s26 }
  0x70   : > { %v782_v21 = vcombine.low %v265_v19, %v272_v20  ;;  %v628_v53 = vrot.slane %v624_v49, 4  ;;  %s1406_s11 = scalar_lea.hbm %s1465_s4, %s800_s15 }
  0x71   : > { %309 = vrot.lane.b32.xlu0 %v784_v12, %s1131_s25 }
  0x72   : > { %v279_v22 = vmul.bf16 %v782_v21, %v248_v4  ;;  %v943_v54 = vpack.i.bf16 %v628_v53, %v627_v52 }
  0x74   : > { %v785_v26 = vcombine.low %v279_v22, %v279_v22  ;;  %v786_v31 = vcombine.high %v279_v22, %v279_v22 }
  0x75   : > { %326 = vrot.lane.b32.xlu0 %v787_v13, %s1129_s27  ;;  %s672_s27 = sshll.u32 %s246_s29, 4  ;;  %s1408_s27 = int_to_ptr.vmem [resolvable:$true] %s672_s27 }
  0x76   : > { %s1021_s18 = scalar_lea.vmem %s1408_s27, 64 }
  0x77   : > { %p1022_p6 = scmp.ne.s32.totalorder %s1408_s27, %s1021_s18 }
  0x79   : > { %p1023_p8 = pnand %p1022_p6, %p1272_p11 }
  0x7b   : > { %p1024_p10 = pneg %p1023_p8 }
  0xdd   : > { %v329_v25 = vpop.permute.xlu1 %328 }
  0xde   : > { %v350_v35 = vsel %vm343_vm2, %v786_v31, %v329_v25 }
  0xe3   : > { %v310_v23 = vpop.permute.xlu0 %309 }
  0xe4   : > { %v311_v24 = vrot.slane %v310_v23, 4 }
  0xe6   : > { %v313_v27 = vsel %vm312_vm0, %v311_v24, %v310_v23 }
  0xe7   : > { %v315_v28 = vmul.bf16 %v313_v27, %v248_v4  ;;  %v327_v29 = vpop.permute.xlu0 %326 }
  0xe8   : > { %v331_v30 = vsel %vm330_vm1, %v327_v29, %v329_v25 }
  0xe9   : > { %v790_v32 = vcombine.high %v315_v28, %v315_v28  ;;  %v789_v33 = vcombine.low %v315_v28, %v315_v28  ;;  %v346_v34 = vsel %vm343_vm2, %v785_v26, %v331_v30 }
  0xea   : > { %821 = vmatpush3.bf16.msra.mxu1 %v346_v34 }
  0xeb   : > { %339 = vrot.lane.b32.xlu0 %v790_v32, %s1132_s10  ;;  %337 = vrot.lane.b32.xlu1 %v789_v33, %s1132_s10  ;;  %s1141_s10 = smov [#allocation7]  }
  0xec   : > { %822 = vmatprep.subr.bf16.mxu1 %v1130_v10 }
  0xef   : > { %365 = vrot.lane.b32.xlu0 %v350_v35, %s1133_s5  ;;  %363 = vrot.lane.b32.xlu1 %v346_v34, %s1133_s5 }
 0x15d   : > { %v340_v36 = vpop.permute.xlu0 %339  ;;  %v338_v37 = vpop.permute.xlu1 %337 }
 0x15e   : > { %369 = vrot.lane.b32.xlu0 %v340_v36, %s1133_s5  ;;  %v342_v38 = vsel %vm341_vm4, %v338_v37, %v340_v36 }
 0x15f   : > { %367 = vrot.lane.b32.xlu1 %v342_v38, %s1133_s5  ;;  %v432_v39 = vsel %vm343_vm2, %v342_v38, 0  ;;  %s1025_s5 = sshll.u32 %s1141_s10, 4  ;;  %s1026_s5 = int_to_ptr.vmem [resolvable:$false] %s1025_s5 }
 0x160   : > { %823 = vmatpush3.bf16.msra.mxu1 %v432_v39  ;;  %p1028_p12 = scmp.lt.s32.totalorder %s1408_s27, %s1026_s5 }
 0x161   : > { %v366_v42 = vpop.permute.xlu0 %365  ;;  %v364_v43 = vpop.permute.xlu1 %363 }
 0x162   : > { %485 = vrot.lane.b32.xlu0 %v350_v35, %s1136_s20  ;;  %v372_v44 = vsel %vm371_vm5, %v364_v43, %v366_v42 }
 0x163   : > { %483 = vrot.lane.b32.xlu1 %v346_v34, %s1136_s20  ;;  %813 = vmatpush3.bf16.msra.mxu0 %v372_v44 }
 0x164   : > { %814 = vmatprep.subr.bf16.mxu0 %v1130_v10  ;;  %825 = vmatmul.mubr.msk.bf16.vlgmr.msra.gmra.mrb[0].mxu1 %vm375_vm6, %v951_v40 }
 0x166   : > { %489 = vrot.lane.b32.xlu0 %v340_v36, %s1136_s20 }
 0x167   : > { %487 = vrot.lane.b32.xlu1 %v342_v38, %s1136_s20  ;;  %s1027_s20 = scalar_lea.vmem %s1026_s5, 128 }
 0x168   : > { %p1029_p13 = scmp.lt.s32.totalorder %s1027_s20, %s1021_s18 }
 0x16a   : > { %553 = vperm.xlu0 %940, %v545_v45   ;;  %p1030_p3 = por %p1029_p13, %p1028_p12 }
 0x16b   : > { %548 = vperm.xlu1 %939, %v544_v46  }
 0x16c   : > { %p1031_p7 = pnand %p1030_p3, %p1024_p10 }
 0x16e   : > { %942 = vset.pattern.permute.xlu0 %v1137_v50 }
 0x16f   : > { %941 = vset.pattern.permute.xlu1 %v1138_v51  ;;  %611 = vperm.xlu0 %942, %v544_v46  }
 0x170   : > { %580 = vperm.xlu1 %941, %v544_v46  }
 0x174   : > { %604 = vperm.xlu1 %941, %v545_v45  }
 0x178   : > { %944 = vrot.lane.b32.xlu1 %v943_v54, %s1139_s23 }
 0x1d0   : > { %v370_v55 = vpop.permute.xlu0 %369 }
 0x1d1   : > { %v368_v56 = vpop.permute.xlu1 %367 }
 0x1d2   : > { %v373_v57 = vsel %vm371_vm5, %v368_v56, %v370_v55 }
 0x1d3   : > { %v380_v58 = vsel %vm343_vm2, %v373_v57, 0 }
 0x1d4   : > { %v486_v60 = vpop.permute.xlu0 %485  ;;  %815 = vmatpush3.bf16.msra.mxu0 %v380_v58 }
 0x1d5   : > { %v484_v61 = vpop.permute.xlu1 %483  ;;  %828 = vmatprep.subr.bf16.mxu0 %v1130_v10 }
 0x1d6   : > { %v492_v62 = vsel %vm491_vm7, %v484_v61, %v486_v60 }
 0x1d7   : > { %817 = vmatmul.mubr.msk.bf16.vlgmr.msra.gmra.mrb[0].mxu0 %vm375_vm6, %v950_v59 }
 0x1d8   : > { %v490_v63 = vpop.permute.xlu0 %489  ;;  %829 = vmatpush3.bf16.msra.mxu0 %v492_v62  ;;  %832 = vmatprep.mubr.msk.bf16.mxu0 %vm1134_vm3, %v1130_v10 }
 0x1d9   : > { %v488_v0 = vpop.permute.xlu1 %487  ;;  %830 = vmatprep.subr.bf16.mxu0 %v1130_v10 }
 0x1da   : > { %v493_v1 = vsel %vm491_vm7, %v488_v0, %v490_v63 }
 0x1db   : > { %v499_v2 = vsel %vm343_vm2, %v493_v1, 0 }
 0x1dc   : > { %831 = vmatpush3.bf16.msra.mxu0 %v499_v2 }
 0x1df   : > { %833 = vmatmul.mubr.msk.bf16.vlgmr.msra.gmra.mrb[4].mxu0 %vm375_vm6, %v952_v3 }
 0x1e9   : > { %v554_v19 = vpop.permute.xlu0 %553 }
 0x1ea   : > { %v549_v16 = vpop.permute.xlu1 %548 }
 0x1ef   : > { %v581_v61 = vpop.permute.xlu1 %580 }
 0x1f3   : > { %v605_v2 = vpop.permute.xlu1 %604 }
 0x237   : > { %v468_v4 = vpop.f32.mrb[0].mxu1 }
 0x238   : > { %v826_v5 = vpop.f32.mrb[1].mxu1 }
 0x239   : > { %v471_v6 = vpop.f32.mrb[2].mxu1  ;;  %v612_v5 = vpop.permute.xlu0 %611 }
 0x23a   : > { %v827_v7 = vpop.f32.mrb[3].mxu1 }
 0x2aa   : > { %v416_v8 = vpop.f32.mrb[0].mxu0 }
 0x2ab   : > { %v469_v9 = vadd.f32 %v468_v4, %v416_v8  ;;  %v818_v11 = vpop.f32.mrb[1].mxu0 }
 0x2ac   : > { %v419_v12 = vpop.f32.mrb[2].mxu0 }
 0x2ad   : > { %v472_v13 = vadd.f32 %v471_v6, %v419_v12  ;;  %v819_v14 = vpop.f32.mrb[3].mxu0 }
 0x2b2   : > { %v535_v15 = vpop.f32.mrb[4].mxu0 }
 0x2b3   : > { %v542_v10 = vadd.f32 %v535_v15, %v469_v9  ;;  %v834_v17 = vpop.f32.mrb[5].mxu0  ;;  %v945_v9 = vpop.permute.xlu1 %944 }
 0x2b4   : > { %v538_v18 = vpop.f32.mrb[6].mxu0  ;;  %v946_v14 = vunpack.i.l.bf16 %v945_v9 }
 0x2b5   : > { %v543_v20 = vadd.f32 %v538_v18, %v472_v13  ;;  %v556_v21 = vadd.f32 %v549_v16, %v542_v10  ;;  %v835_v22 = vpop.f32.mrb[7].mxu0  ;;  %v947_v13 = vunpack.i.h.bf16 %v945_v9 }
 0x2b7   : > { %v559_v23 = vrot.slane %v556_v21, 4  ;;  %v557_v24 = vadd.f32 %v554_v19, %v543_v20  ;;  %v634_v16 = vsel %vm633_vm8, %v946_v14, %v947_v13 }
 0x2b9   : > { %v560_v25 = vadd.f32 %v559_v23, %v556_v21  ;;  %v584_v26 = vrot.slane %v557_v24, 4 }
 0x2bb   : > { %v561_v27 = vrot.slane %v560_v25, 2  ;;  %v585_v28 = vadd.f32 %v584_v26, %v557_v24 }
 0x2bd   : > { %v562_v29 = vadd.f32 %v561_v27, %v560_v25  ;;  %v586_v30 = vrot.slane %v585_v28, 2 }
 0x2bf   : > { %v587_v31 = vadd.f32 %v586_v30, %v585_v28  ;;  %v563_v32 = vrot.slane %v562_v29, 1 }
 0x2c1   : > { %v564_v33 = vadd.f32 %v563_v32, %v562_v29  ;;  %v588_v34 = vrot.slane %v587_v31, 1 }
 0x2c3   : > { %v566_v35 = vmul.f32 0.125, %v564_v33  ;;  %v589_v36 = vadd.f32 %v588_v34, %v587_v31 }
 0x2c5   : > { %v567_v37 = vsub.f32 %v556_v21, %v566_v35  ;;  %v590_v38 = vmul.f32 0.125, %v589_v36 }
 0x2c7   : > { %v568_v39 = vmul.f32 %v567_v37, %v567_v37  ;;  %v591_v40 = vsub.f32 %v557_v24, %v590_v38 }
 0x2c9   : > { %v569_v41 = vrot.slane %v568_v39, 4  ;;  %v592_v42 = vmul.f32 %v591_v40, %v591_v40 }
 0x2cb   : > { %v570_v43 = vadd.f32 %v569_v41, %v568_v39  ;;  %v593_v44 = vrot.slane %v592_v42, 4 }
 0x2cd   : > { %v571_v45 = vrot.slane %v570_v43, 2  ;;  %v594_v46 = vadd.f32 %v593_v44, %v592_v42 }
 0x2cf   : > { %v572_v50 = vadd.f32 %v571_v45, %v570_v43  ;;  %v595_v51 = vrot.slane %v594_v46, 2 }
 0x2d1   : > { %v573_v52 = vrot.slane %v572_v50, 1  ;;  %v596_v53 = vadd.f32 %v595_v51, %v594_v46 }
 0x2d3   : > { %v574_v54 = vadd.f32 %v573_v52, %v572_v50  ;;  %v597_v55 = vrot.slane %v596_v53, 1 }
 0x2d5   : > { %v575_v56 = vmul.f32 0.125, %v574_v54  ;;  %v598_v57 = vadd.f32 %v597_v55, %v596_v53 }
 0x2d7   : > { %v576_v58 = vadd.f32 1e-05, %v575_v56  ;;  %v599_v59 = vmul.f32 0.125, %v598_v57 }
 0x2d9   : > { %953 = vrsqrt.f32 %v576_v58  ;;  %v600_v60 = vadd.f32 1e-05, %v599_v59 }
 0x2db   : > { %955 = vrsqrt.f32 %v600_v60 }
 0x2e3   : > { %v954_v62 = vpop.eup %953 }
 0x2e4   : > { %v578_v63 = vmul.f32 %v954_v62, %v567_v37 }
 0x2e5   : > { %v956_v0 = vpop.eup %955 }
 0x2e6   : > { %v602_v1 = vmul.f32 %v956_v0, %v591_v40  ;;  %v583_v3 = vmul.f32 %v581_v61, %v578_v63 }
 0x2e8   : > { %v607_v4 = vmul.f32 %v605_v2, %v602_v1 }
 0x2ea   : > { %v608_v6 = vadd.f32 %v607_v4, %v583_v3 }
 0x2ec   : > { %v614_v7 = vadd.f32 %v612_v5, %v608_v6 }
 0x2ee   : > { %v797_v8 = vmul.f32 -1.442695, %v614_v7 }
 0x2f0   : > { %957 = vpow2.f32 %v797_v8 }
 0x2f1   : > { %959 = vtanh.f32 %v614_v7 }
 0x2fa   : > { %v958_v11 = vpop.eup %957 }
 0x2fb   : > { %v619_v12 = vadd.f32 1.0, %v958_v11  ;;  %v960_v15 = vpop.eup %959 }
 0x2fc   : > { %v636_v10 = vsub.f32 %v960_v15, %v634_v16 }
 0x2fd   : > { %961 = vrcp.f32 %v619_v12 }
 0x2fe   : > { %v638_v17 = vrot.slane %v636_v10, 4 }
 0x307   : > { %v962_v18 = vpop.eup %961 }
 0x308   : > { %v640_v19 = vmul.f32 %v962_v18, %v638_v17 }
 0x30a   : > { %642 = vrot.lane.b32.xlu1 %v640_v19, %s1140_s24 }
 0x37c   : > { %v643_v20 = vpop.permute.xlu1 %642 }
 0x37d   : > { %v645_v21 = vadd.f32 %v643_v20, %v623_v48  ;;  %v646_v22 = vadd.f32 %v643_v20, %v624_v49 }
 0x37f   : > { %651 = vrot.lane.b32.xlu1 %v646_v22, %s1139_s23  ;;  %649 = vrot.lane.b32.xlu0 %v645_v21, %s1139_s23 }
 0x3f1   : > { %v652_v23 = vpop.permute.xlu1 %651  ;;  %v650_v24 = vpop.permute.xlu0 %649 }
 0x3f2   : > { %v653_v47 = vsel %vm633_vm8, %v650_v24, %v652_v23 }
 0x3f3   : > { %655 = vst [vmem:[%s246_s29 - $0x4] sm:$0xf0] %v653_v47 }
 0x3f4   : > { %1034 = shalt.err (!%p1031_p7)
}
 0x3f5   : > { %s1035_s26 = scalar_lea.hbm %s1406_s11, 64  ;;  %s1039_s12 = scalar_lea.hbm %s1465_s4, 256 }
 0x3f6   : > { %p1036_p1 = scmp.ne.s32.totalorder %s1406_s11, %s1035_s26  ;;  %p1040_p9 = scmp.lt.u32.totalorder %s1406_s11, %s1465_s4 }
 0x3f7   : > { %p1041_p5 = scmp.lt.u32.totalorder %s1039_s12, %s1035_s26  ;;  %p1043_p6 = scmp.lt.u32.totalorder %s1035_s26, %s1406_s11 }
 0x3f8   : > { %p1037_p2 = pnand %p1036_p1, %p1272_p11 }
 0x3f9   : > { %p1042_p0 = por %p1041_p5, %p1040_p9 }
 0x3fa   : > { %p1038_p4 = pneg %p1037_p2 }
 0x3fb   : > { %p1044_p8 = por %p1043_p6, %p1042_p0 }
 0x3fd   : > { %p1045_p10 = pnand %p1044_p8, %p1038_p4 }
 0x3ff   : > { %1048 = shalt.err (!%p1045_p10)
}
 0x400   : > { %842 = dma.vmem_to_hbm [thread:$0]  (%p1272_p11), %s1408_s27, 64, %s1406_s11, %s657_s19  }
 0x401 PF: > { %s1495_s24 = sld [smem:[#allocation11_spill]]  ;;  %s1496_s30 = sld [smem:[#allocation13_spill]] }
 0x402   : > { %p859_p12 = scmp.ge.s32.totalorder %s1123_s22, 2 }
 0x407   : > { %s684_s13 = sand.u32 1, %s1495_s24   ;;  %p1497_p13 = scmp.ne.s32.totalorder %s1496_s30, 0 }
 0x408   : > { %s685_s8 = scalar_lea.sflag [#allocation4], %s684_s13 }
 0x409   : > { %p853_p3 = pnand %p859_p12, %p1497_p13 }
 0x40b   : > { %1090 = dma.done.wait (!%p853_p3), %s685_s8, 64  }
 0x40c   : > { %1092 = vsyncadd (!%p853_p3), %s685_s8, 4294967232  ;;  %s21_s22 = sadd.s32 1, %s1123_s22   ;;  %s1498_s18 = sld [smem:[#allocation12_spill]] }
 0x40d   : > { %p18_p7 = scmp.ge.s32.totalorder %s21_s22, 6   ;;  %s1499_s20 = sld [smem:[#allocation14_spill]] }
 0x40e   : > { %s1500_s6 = sld [smem:[#allocation15_spill]]  ;;  %s1501_s15 = smov %s1099_s16 }
 0x40f   : > { %s1502_s16 = smov %s1103_s17  ;;  %s1503_s17 = smov %s1289_s1 }
 0x410   : > { %s1504_s19 = smov %s1119_s21  ;;  %20 = sbr.rel (!%p18_p7) target bundleno = 10 (0xa), region = 87 }
 0x414   : > { %s1505_s21 = smov %s1500_s6 }
 0x417   :  { %690 = vsyncpa [#allocation3], 1 }
 0x418   :  { %692 = vsyncpa [#allocation3 + $0x1], 1 }
 0x419   :  { %693 = vsyncpa [#allocation6], 1 }
 0x41a   :  { %694 = vsyncpa [#allocation4], 1 }
 0x41b   :  { %696 = vsyncpa [#allocation4 + $0x1], 1 }

</bundles_post_ra>
